<compile_context>
chip_gen: v5e
topology: v5e:2x2
jax: 0.10.0
libtpu: 0.0.40
codegen_flags: <defaults>
</compile_context>

<pallas_src>
import functools

import jax
import jax.numpy as jnp
from jax import lax
from jax.experimental import pallas as pl
from jax.experimental.pallas import tpu as pltpu

D_IN = 48          # input / output feature width
D_ATT = 8          # K / Q / V width
D_VKQ = 3 * D_ATT  # fused projection width:  [ V | K | Q/sqrt(8) ]

# lhs-transposed matmul: contract over axis 0 of both operands (a^T @ b) without
# materializing the transpose of the full (TILE_N, 24) tensor.
_TN_DIMS = (((0,), (0,)), ((), ()))

_ROW_ALIGN = 32    # row-tile alignment that is layout-safe for f32 / bf16 / int8


def _round_up(x, m):
    return (x + m - 1) // m * m


# --------------------------------------------------------------------------- kernels
def _phase1_kernel(n_rows, tile_n,
                   x_ref, w_vkq_ref, b_vkq_ref, wz_ref,
                   v_ref, weff_ref, gram_ref):
    """Stream x, emit V, accumulate the global gram matrix, finalize softmax -> w_eff."""
    i = pl.program_id(0)

    @pl.when(i == 0)
    def _init():
        gram_ref[...] = jnp.zeros_like(gram_ref)

    x = x_ref[...].astype(jnp.float32)

    # Single fused projection: (TILE_N, 48) @ (48, 24) -> [ V | K | Q/sqrt(8) ].
    vkq = jnp.dot(x, w_vkq_ref[...], preferred_element_type=jnp.float32) + b_vkq_ref[...]

    # V occupies lanes 0:8 -> lane-aligned slice, no cross-lane relayout of the big tile.
    v_ref[...] = vkq[:, :D_ATT].astype(v_ref.dtype)

    if n_rows % tile_n != 0:
        # Zero-padded rows must not contribute to the global score reduction.
        row = i * tile_n + lax.broadcasted_iota(jnp.int32, (tile_n, 1), 0)
        vkq = jnp.where(row < n_rows, vkq, 0.0)

    # Accumulate the full 24x24 gram matrix instead of slicing K/Q out of the
    # (TILE_N, 24) tile (which would need per-vreg lane rotates): the output is a
    # single MXU tile either way, so the MXU cost is identical.
    gram_ref[...] += lax.dot_general(vkq, vkq, _TN_DIMS,
                                     preferred_element_type=jnp.float32)

    @pl.when(i == pl.num_programs(0) - 1)
    def _finalize():
        gram = gram_ref[...]
        # scores = (Q/sqrt(8))^T @ K   (scale already folded into the Q weight columns)
        scores = gram[2 * D_ATT:3 * D_ATT, D_ATT:2 * D_ATT]
        m = jnp.max(scores, axis=-1, keepdims=True)
        e = jnp.exp(scores - m)
        # Softmax runs once per kernel on an 8x8 matrix; the exact reciprocal is free
        # here and keeps f32-tight numerics (approx=True only matters per-row).
        am = e * pl.reciprocal(jnp.sum(e, axis=-1, keepdims=True), approx=False)
        # Fold the output projection into the attention matrix once:
        #   out = (V @ AM) @ Wz == V @ (AM @ Wz)
        weff_ref[...] = jnp.dot(am, wz_ref[...], preferred_element_type=jnp.float32)


def _phase2_kernel(v_ref, weff_ref, bz_ref, out_ref):
    """Stream V tiles and apply the folded attention + output projection."""
    v = v_ref[...].astype(jnp.float32)
    out = jnp.dot(v, weff_ref[...], preferred_element_type=jnp.float32) + bz_ref[...]
    out_ref[...] = out.astype(out_ref.dtype)


# --------------------------------------------------------------------------- params
def init_params(key):
    """PyTorch-style nn.Linear params; weights stored as (in, out) = W.T."""
    ks = jax.random.split(key, 8)

    def uni(k, shape, fan_in):
        bound = 1.0 / jnp.sqrt(jnp.float32(fan_in))
        return jax.random.uniform(k, shape, jnp.float32, -bound, bound)

    wk = uni(ks[0], (D_IN, D_ATT), D_IN)
    bk = uni(ks[1], (1, D_ATT), D_IN)
    wq = uni(ks[2], (D_IN, D_ATT), D_IN)
    bq = uni(ks[3], (1, D_ATT), D_IN)
    wv = uni(ks[4], (D_IN, D_ATT), D_IN)
    bv = uni(ks[5], (1, D_ATT), D_IN)
    wz = uni(ks[6], (D_ATT, D_IN), D_ATT)
    bz = uni(ks[7], (1, D_IN), D_ATT)
    return wk, bk, wq, bq, wv, bv, wz, bz


def _fuse_params(params):
    """Fused [V | K | Q*inv_scale] projection; 1/sqrt(8) folded into the Q columns."""
    wk, bk, wq, bq, wv, bv, wz, bz = params
    inv_scale = 1.0 / jnp.sqrt(jnp.float32(D_ATT))
    w_vkq = jnp.concatenate([wv, wk, wq * inv_scale], axis=1)   # (48, 24)
    b_vkq = jnp.concatenate([bv, bk, bq * inv_scale], axis=1)   # (1, 24)
    return w_vkq, b_vkq, wz, bz


# --------------------------------------------------------------------------- wrapper
@functools.partial(jax.jit, static_argnames=("tile_n", "stream_dtype"))
def ultimus_forward(x, params, *, tile_n=4096, stream_dtype=jnp.float32):
    """UltimusBlock forward.  `stream_dtype` controls HBM streaming precision
    (bf16 roughly halves traffic for this HBM-bound kernel); accumulation stays f32."""
    w_vkq, b_vkq, wz, bz = _fuse_params(params)

    x2 = x.reshape(-1, D_IN)
    n = x2.shape[0]

    tile = min(_round_up(int(tile_n), _ROW_ALIGN), _round_up(n, _ROW_ALIGN))
    n_pad = _round_up(n, tile)
    grid = n_pad // tile

    x2 = x2.astype(stream_dtype)
    if n_pad != n:
        x2 = jnp.pad(x2, ((0, n_pad - n), (0, 0)))

    def _const2d(shape):
        # Whole-array blocks with a constant index map: weights/biases stay
        # VMEM-resident across grid steps instead of riding the tiled pipeline.
        return pl.BlockSpec(shape, lambda i: (0, 0))

    # ---- phase 1: x -> V tiles + w_eff --------------------------------------------
    v_stream, w_eff = pl.pallas_call(
        functools.partial(_phase1_kernel, n, tile),
        grid=(grid,),
        in_specs=[
            pl.BlockSpec((tile, D_IN), lambda i: (i, 0)),   # x (streamed, double-buffered)
            _const2d((D_IN, D_VKQ)),                        # fused projection weight
            _const2d((1, D_VKQ)),                           # fused projection bias
            _const2d((D_ATT, D_IN)),                        # Wz
        ],
        out_specs=(
            pl.BlockSpec((tile, D_ATT), lambda i: (i, 0)),  # V (streamed out)
            _const2d((D_ATT, D_IN)),                        # w_eff (written on last step)
        ),
        out_shape=(
            jax.ShapeDtypeStruct((n_pad, D_ATT), stream_dtype),
            jax.ShapeDtypeStruct((D_ATT, D_IN), jnp.float32),
        ),
        scratch_shapes=[pltpu.VMEM((D_VKQ, D_VKQ), jnp.float32)],
        compiler_params=pltpu.CompilerParams(
            # global score reduction across the grid -> must stay sequential
            dimension_semantics=("arbitrary",)),
    )(x2, w_vkq, b_vkq, wz)

    # ---- phase 2: V -> out ----------------------------------------------------------
    out = pl.pallas_call(
        _phase2_kernel,
        grid=(grid,),
        in_specs=[
            pl.BlockSpec((tile, D_ATT), lambda i: (i, 0)),  # V (streamed)
            _const2d((D_ATT, D_IN)),                        # w_eff = AM @ Wz
            _const2d((1, D_IN)),                            # bz
        ],
        out_specs=pl.BlockSpec((tile, D_IN), lambda i: (i, 0)),
        out_shape=jax.ShapeDtypeStruct((n_pad, D_IN), stream_dtype),
        compiler_params=pltpu.CompilerParams(
            # independent row tiles -> shard across TensorCores on v7x megacore
            dimension_semantics=("parallel",)),
    )(v_stream, w_eff, bz)

    return out[:n]


def ultimus_reference(x, params):
    """Pure-JAX reference mirroring the PyTorch forward exactly."""
    wk, bk, wq, bq, wv, bv, wz, bz = params
    x2 = x.reshape(-1, D_IN).astype(jnp.float32)
    k = x2 @ wk + bk
    q = x2 @ wq + bq
    v = x2 @ wv + bv
    am = jax.nn.softmax((q.T @ k) / jnp.sqrt(jnp.float32(D_ATT)), axis=-1)
    z = v @ am
    return z @ wz + bz


if __name__ == "__main__":
    key = jax.random.PRNGKey(0)
    k_param, k_x1, k_x2 = jax.random.split(key, 3)
    params = init_params(k_param)

    # Case 1: tiny batch (single grid step; exercises 8 -> 32 row padding + masking).
    x_small = jax.random.normal(k_x1, (8, D_IN), dtype=jnp.float32)
    out_small = jax.block_until_ready(ultimus_forward(x_small, params))
    ref_small = ultimus_reference(x_small, params)
    assert out_small.shape == (8, D_IN)
    assert jnp.allclose(out_small, ref_small, atol=1e-4, rtol=1e-4), "f32 small mismatch"

    # Case 2: multi-tile grid with a ragged last tile (global softmax reduction
    # accumulated across 4 grid steps, then second streaming pass).
    x_big = jax.random.normal(k_x2, (200, D_IN), dtype=jnp.float32)
    out_big = jax.block_until_ready(ultimus_forward(x_big, params, tile_n=64))
    ref_big = ultimus_reference(x_big, params)
    assert out_big.shape == (200, D_IN)
    assert jnp.allclose(out_big, ref_big, atol=1e-4, rtol=1e-4), "f32 tiled mismatch"

    # Case 3: bf16 HBM streaming (f32 accumulation inside the kernel).
    out_bf16 = jax.block_until_ready(
        ultimus_forward(x_big, params, tile_n=64, stream_dtype=jnp.bfloat16))
    assert out_bf16.shape == (200, D_IN)
    assert jnp.allclose(out_bf16.astype(jnp.float32), ref_big, atol=1e-1, rtol=1e-1), \
        "bf16 streaming mismatch"

    print("KERNEL_OK")
</pallas_src>

<mosaic_0001>
module attributes {stable_mosaic.version = 11 : i64} {
  func.func @_phase2_kernel(%arg0: i32, %arg1: memref<32x8xf32, #tpu.memory_space<vmem>>, %arg2: memref<8x48xf32, #tpu.memory_space<vmem>>, %arg3: memref<1x48xf32, #tpu.memory_space<vmem>>, %arg4: memref<32x48xf32, #tpu.memory_space<vmem>>) attributes {dimension_semantics = [#tpu.dimension_semantics<parallel>], iteration_bounds = array<i64: 1>, scalar_prefetch = 0 : i64, scratch_operands = 0 : i64, tpu.core_type = #tpu.core_type<tc>, window_params = [{transform_indices = @transform_0, window_bounds = array<i64: 32, 8>}, {pipeline_mode = #tpu.pipeline_mode<synchronous>, transform_indices = @transform_1, window_bounds = array<i64: 8, 48>}, {pipeline_mode = #tpu.pipeline_mode<synchronous>, transform_indices = @transform_2, window_bounds = array<i64: 1, 48>}, {transform_indices = @transform_3, window_bounds = array<i64: 32, 48>}]} {
    %c0 = arith.constant 0 : index
    %c0_0 = arith.constant 0 : index
    %0 = vector.load %arg1[%c0, %c0_0] : memref<32x8xf32, #tpu.memory_space<vmem>>, vector<32x8xf32>
    %c0_1 = arith.constant 0 : index
    %c0_2 = arith.constant 0 : index
    %1 = vector.load %arg2[%c0_1, %c0_2] : memref<8x48xf32, #tpu.memory_space<vmem>>, vector<8x48xf32>
    %cst = arith.constant dense<0.000000e+00> : vector<32x48xf32>
    %2 = tpu.matmul %0, %1, %cst {dimension_numbers = #tpu.dot_dimension_numbers<[1], [0], [0], [1], [0, 0, 1, 1], [], []>} : vector<32x8xf32>, vector<8x48xf32>, vector<32x48xf32> -> vector<32x48xf32>
    %c0_3 = arith.constant 0 : index
    %c0_4 = arith.constant 0 : index
    %3 = vector.load %arg3[%c0_3, %c0_4] : memref<1x48xf32, #tpu.memory_space<vmem>>, vector<1x48xf32>
    %4 = vector.broadcast %3 : vector<1x48xf32> to vector<32x48xf32>
    %5 = arith.addf %2, %4 : vector<32x48xf32>
    %c0_5 = arith.constant 0 : index
    %c0_6 = arith.constant 0 : index
    %6 = vector.load %arg4[%c0_5, %c0_6] : memref<32x48xf32, #tpu.memory_space<vmem>>, vector<32x48xf32>
    tpu.vector_store %arg4[%c0_5, %c0_6], %5 {strides = array<i32>} : memref<32x48xf32, #tpu.memory_space<vmem>>, vector<32x48xf32>,
    return
  }
  func.func @transform_0(%arg0: i32) -> (i32, i32) {
    %c0_i32 = arith.constant 0 : i32
    %c0_i32_0 = arith.constant 0 : i32
    return %arg0, %c0_i32 : i32, i32
  }
  func.func @transform_1(%arg0: i32) -> (i32, i32) {
    %c0_i32 = arith.constant 0 : i32
    %c0_i32_0 = arith.constant 0 : i32
    %c0_i32_1 = arith.constant 0 : i32
    return %c0_i32, %c0_i32_0 : i32, i32
  }
  func.func @transform_2(%arg0: i32) -> (i32, i32) {
    %c0_i32 = arith.constant 0 : i32
    %c0_i32_0 = arith.constant 0 : i32
    %c0_i32_1 = arith.constant 0 : i32
    return %c0_i32, %c0_i32_0 : i32, i32
  }
  func.func @transform_3(%arg0: i32) -> (i32, i32) {
    %c0_i32 = arith.constant 0 : i32
    %c0_i32_0 = arith.constant 0 : i32
    return %arg0, %c0_i32 : i32, i32
  }
}

module attributes {stable_mosaic.version = 11 : i64} {
  func.func @_phase1_kernel(%arg0: i32, %arg1: memref<32x48xf32, #tpu.memory_space<vmem>>, %arg2: memref<48x24xf32, #tpu.memory_space<vmem>>, %arg3: memref<1x24xf32, #tpu.memory_space<vmem>>, %arg4: memref<8x48xf32, #tpu.memory_space<vmem>>, %arg5: memref<32x8xf32, #tpu.memory_space<vmem>>, %arg6: memref<8x48xf32, #tpu.memory_space<vmem>>, %arg7: memref<24x24xf32, #tpu.memory_space<vmem>>) attributes {dimension_semantics = [#tpu.dimension_semantics<arbitrary>], iteration_bounds = array<i64: 1>, scalar_prefetch = 0 : i64, scratch_operands = 1 : i64, tpu.core_type = #tpu.core_type<tc>, window_params = [{transform_indices = @transform_0, window_bounds = array<i64: 32, 48>}, {pipeline_mode = #tpu.pipeline_mode<synchronous>, transform_indices = @transform_1, window_bounds = array<i64: 48, 24>}, {pipeline_mode = #tpu.pipeline_mode<synchronous>, transform_indices = @transform_2, window_bounds = array<i64: 1, 24>}, {pipeline_mode = #tpu.pipeline_mode<synchronous>, transform_indices = @transform_3, window_bounds = array<i64: 8, 48>}, {transform_indices = @transform_4, window_bounds = array<i64: 32, 8>}, {pipeline_mode = #tpu.pipeline_mode<synchronous>, transform_indices = @transform_5, window_bounds = array<i64: 8, 48>}]} {
    %c0_i32 = arith.constant 0 : i32
    %0 = arith.cmpi eq, %arg0, %c0_i32 : i32
    %1 = arith.extui %0 : i1 to i32
    %c0_i32_0 = arith.constant 0 : i32
    %2 = arith.cmpi ne, %1, %c0_i32_0 : i32
    scf.if %2 {
      %cst_16 = arith.constant 0.000000e+00 : f32
      %28 = vector.broadcast %cst_16 : f32 to vector<24x24xf32>
      %c0_17 = arith.constant 0 : index
      %c0_18 = arith.constant 0 : index
      %29 = vector.load %arg7[%c0_17, %c0_18] : memref<24x24xf32, #tpu.memory_space<vmem>>, vector<24x24xf32>
      tpu.vector_store %arg7[%c0_17, %c0_18], %28 {strides = array<i32>} : memref<24x24xf32, #tpu.memory_space<vmem>>, vector<24x24xf32>,
    } else {
    }
    %c0 = arith.constant 0 : index
    %c0_1 = arith.constant 0 : index
    %3 = vector.load %arg1[%c0, %c0_1] : memref<32x48xf32, #tpu.memory_space<vmem>>, vector<32x48xf32>
    %c0_2 = arith.constant 0 : index
    %c0_3 = arith.constant 0 : index
    %4 = vector.load %arg2[%c0_2, %c0_3] : memref<48x24xf32, #tpu.memory_space<vmem>>, vector<48x24xf32>
    %cst = arith.constant dense<0.000000e+00> : vector<32x24xf32>
    %5 = tpu.matmul %3, %4, %cst {dimension_numbers = #tpu.dot_dimension_numbers<[1], [0], [0], [1], [0, 0, 1, 1], [], []>} : vector<32x48xf32>, vector<48x24xf32>, vector<32x24xf32> -> vector<32x24xf32>
    %c0_4 = arith.constant 0 : index
    %c0_5 = arith.constant 0 : index
    %6 = vector.load %arg3[%c0_4, %c0_5] : memref<1x24xf32, #tpu.memory_space<vmem>>, vector<1x24xf32>
    %7 = vector.broadcast %6 : vector<1x24xf32> to vector<32x24xf32>
    %8 = arith.addf %5, %7 : vector<32x24xf32>
    %9 = vector.extract_strided_slice %8 {offsets = [0, 0], sizes = [32, 8], strides = [1, 1]} : vector<32x24xf32> to vector<32x8xf32>
    %c0_6 = arith.constant 0 : index
    %c0_7 = arith.constant 0 : index
    %10 = vector.load %arg5[%c0_6, %c0_7] : memref<32x8xf32, #tpu.memory_space<vmem>>, vector<32x8xf32>
    tpu.vector_store %arg5[%c0_6, %c0_7], %9 {strides = array<i32>} : memref<32x8xf32, #tpu.memory_space<vmem>>, vector<32x8xf32>,
    %c32_i32 = arith.constant 32 : i32
    %11 = arith.muli %arg0, %c32_i32 : i32
    %12 = tpu.iota {dimensions = array<i32: 0>} : vector<32x1xi32>
    %13 = vector.broadcast %11 : i32 to vector<32x1xi32>
    %14 = arith.addi %13, %12 : vector<32x1xi32>
    %c8_i32 = arith.constant 8 : i32
    %15 = vector.broadcast %c8_i32 : i32 to vector<32x1xi32>
    %16 = arith.cmpi slt, %14, %15 : vector<32x1xi32>
    %cst_8 = arith.constant 0.000000e+00 : f32
    %17 = vector.shape_cast %16 : vector<32x1xi1> to vector<32x1xi1>
    %18 = vector.broadcast %17 : vector<32x1xi1> to vector<32x24xi1>
    %19 = vector.broadcast %cst_8 : f32 to vector<32x24xf32>
    %20 = arith.select %18, %8, %19 : vector<32x24xi1>, vector<32x24xf32>
    %c0_9 = arith.constant 0 : index
    %c0_10 = arith.constant 0 : index
    %21 = vector.load %arg7[%c0_9, %c0_10] : memref<24x24xf32, #tpu.memory_space<vmem>>, vector<24x24xf32>
    %cst_11 = arith.constant dense<0.000000e+00> : vector<24x24xf32>
    %22 = tpu.matmul %20, %20, %cst_11 {dimension_numbers = #tpu.dot_dimension_numbers<[0], [0], [1], [1], [0, 1, 1, 1], [], []>} : vector<32x24xf32>, vector<32x24xf32>, vector<24x24xf32> -> vector<24x24xf32>
    %23 = arith.addf %21, %22 : vector<24x24xf32>
    %c0_12 = arith.constant 0 : index
    %c0_13 = arith.constant 0 : index
    %24 = vector.load %arg7[%c0_12, %c0_13] : memref<24x24xf32, #tpu.memory_space<vmem>>, vector<24x24xf32>
    tpu.vector_store %arg7[%c0_12, %c0_13], %23 {strides = array<i32>} : memref<24x24xf32, #tpu.memory_space<vmem>>, vector<24x24xf32>,
    %c0_i32_14 = arith.constant 0 : i32
    %25 = arith.cmpi eq, %arg0, %c0_i32_14 : i32
    %26 = arith.extui %25 : i1 to i32
    %c0_i32_15 = arith.constant 0 : i32
    %27 = arith.cmpi ne, %26, %c0_i32_15 : i32
    scf.if %27 {
      %c0_16 = arith.constant 0 : index
      %c0_17 = arith.constant 0 : index
      %28 = vector.load %arg7[%c0_16, %c0_17] : memref<24x24xf32, #tpu.memory_space<vmem>>, vector<24x24xf32>
      %29 = vector.extract_strided_slice %28 {offsets = [16, 8], sizes = [8, 8], strides = [1, 1]} : vector<24x24xf32> to vector<8x8xf32>
      %cst_18 = arith.constant dense<0xFF800000> : vector<8xf32>
      %30 = vector.multi_reduction <maximumf>, %29, %cst_18 [1] : vector<8x8xf32> to vector<8xf32>
      %31 = vector.shape_cast %30 : vector<8xf32> to vector<8x1xf32>
      %32 = vector.broadcast %31 : vector<8x1xf32> to vector<8x8xf32>
      %33 = arith.subf %29, %32 : vector<8x8xf32>
      %34 = math.exp %33 : vector<8x8xf32>
      %cst_19 = arith.constant dense<0.000000e+00> : vector<8xf32>
      %35 = vector.multi_reduction <add>, %34, %cst_19 [1] : vector<8x8xf32> to vector<8xf32>
      %36 = vector.shape_cast %35 : vector<8xf32> to vector<8x1xf32>
      %37 = tpu.reciprocal %36 : vector<8x1xf32> -> vector<8x1xf32>
      %38 = vector.broadcast %37 : vector<8x1xf32> to vector<8x8xf32>
      %39 = arith.mulf %34, %38 : vector<8x8xf32>
      %c0_20 = arith.constant 0 : index
      %c0_21 = arith.constant 0 : index
      %40 = vector.load %arg4[%c0_20, %c0_21] : memref<8x48xf32, #tpu.memory_space<vmem>>, vector<8x48xf32>
      %cst_22 = arith.constant dense<0.000000e+00> : vector<8x48xf32>
      %41 = tpu.matmul %39, %40, %cst_22 {dimension_numbers = #tpu.dot_dimension_numbers<[1], [0], [0], [1], [0, 0, 1, 1], [], []>} : vector<8x8xf32>, vector<8x48xf32>, vector<8x48xf32> -> vector<8x48xf32>
      %c0_23 = arith.constant 0 : index
      %c0_24 = arith.constant 0 : index
      %42 = vector.load %arg6[%c0_23, %c0_24] : memref<8x48xf32, #tpu.memory_space<vmem>>, vector<8x48xf32>
      tpu.vector_store %arg6[%c0_23, %c0_24], %41 {strides = array<i32>} : memref<8x48xf32, #tpu.memory_space<vmem>>, vector<8x48xf32>,
    } else {
    }
    return
  }
  func.func @transform_0(%arg0: i32) -> (i32, i32) {
    %c0_i32 = arith.constant 0 : i32
    %c0_i32_0 = arith.constant 0 : i32
    return %arg0, %c0_i32 : i32, i32
  }
  func.func @transform_1(%arg0: i32) -> (i32, i32) {
    %c0_i32 = arith.constant 0 : i32
    %c0_i32_0 = arith.constant 0 : i32
    %c0_i32_1 = arith.constant 0 : i32
    return %c0_i32, %c0_i32_0 : i32, i32
  }
  func.func @transform_2(%arg0: i32) -> (i32, i32) {
    %c0_i32 = arith.constant 0 : i32
    %c0_i32_0 = arith.constant 0 : i32
    %c0_i32_1 = arith.constant 0 : i32
    return %c0_i32, %c0_i32_0 : i32, i32
  }
  func.func @transform_3(%arg0: i32) -> (i32, i32) {
    %c0_i32 = arith.constant 0 : i32
    %c0_i32_0 = arith.constant 0 : i32
    %c0_i32_1 = arith.constant 0 : i32
    return %c0_i32, %c0_i32_0 : i32, i32
  }
  func.func @transform_4(%arg0: i32) -> (i32, i32) {
    %c0_i32 = arith.constant 0 : i32
    %c0_i32_0 = arith.constant 0 : i32
    return %arg0, %c0_i32 : i32, i32
  }
  func.func @transform_5(%arg0: i32) -> (i32, i32) {
    %c0_i32 = arith.constant 0 : i32
    %c0_i32_0 = arith.constant 0 : i32
    %c0_i32_1 = arith.constant 0 : i32
    return %c0_i32, %c0_i32_0 : i32, i32
  }
}

</mosaic_0001>

<bundles_post_ra>
// kernel: ultimus_forward.3
= control target key start
LH: loop header
LB: loop body
LE: loop exit
PB: predicated region body
PF: predicated region fallthrough
CT: control target
= control target key end

     0   :  { %vm23_vm0 = vcmask 64512   ;;  %vm65_vm1 = vcmask 392192   ;;  %s132_s1 = inlined_call_operand.vmem [shape: f32[8,48], index: 1, kind: input, shape index: {}]   ;;  %s133_s0 = inlined_call_operand.vmem [shape: f32[32,8], index: 0, kind: input, shape index: {}]   ;;  %s134_s2 = inlined_call_operand.vmem [shape: f32[1,48], index: 2, kind: input, shape index: {}]   ;;  %s135_s3 = inlined_call_operand.vmem [shape: f32[32,48], index: 3, kind: output, shape index: {}]  }
   0x1   :  { %v18_v0 = vld [vmem:[%s132_s1] sm:$0xff]  ;;  %v16_v1 = vld [vmem:[%s133_s0 + $0x10] sm:$0xff]  ;;  %v17_v2 = vld [vmem:[%s133_s0 + $0x18] sm:$0xff] }
   0x2   :  { %79 = vmatpush.msra.mxu2 %v18_v0  ;;  %80 = vmatpush.msra.mxu3 %v18_v0  ;;  %v14_v3 = vld [vmem:[%s133_s0] sm:$0xff]  ;;  %v15_v4 = vld [vmem:[%s133_s0 + $0x8] sm:$0xff] }
   0x3   :  { %76 = vmatmul.msk.f32.vlgmr.msra.gmra.mxu2 %vm23_vm0, %v16_v1  ;;  %77 = vmatmul.msk.f32.vlgmr.msra.gmra.mxu3 %vm23_vm0, %v17_v2  ;;  %v81_v5 = vld [vmem:[%s134_s2] ss:$0 sm:$0xff] }
   0x4   :  { %51 = vmatpush.msra.mxu0 %v18_v0  ;;  %78 = vmatpush.msra.mxu1 %v18_v0 }
   0x5   :  { %74 = vmatmul.msk.f32.vlgmr.msra.gmra.mxu0 %vm23_vm0, %v14_v3  ;;  %75 = vmatmul.msk.f32.vlgmr.msra.gmra.mxu1 %vm23_vm0, %v15_v4 }
  0x82   :  { %v53_v6 = vpop.f32.mrf.mxu0  ;;  %v56_v7 = vpop.f32.mrf.mxu1 }
  0x83   :  { %v54_v8 = vadd.f32 %v81_v5, %v53_v6  ;;  %v57_v9 = vadd.f32 %v81_v5, %v56_v7 }
  0x85   :  { %66 = vst.msk [vmem:[%s135_s3] sm:$0xff] %vm65_vm1, %v54_v8 }
  0x86   :  { %67 = vst.msk [vmem:[%s135_s3 + $0x8] sm:$0xff] %vm65_vm1, %v57_v9  ;;  %v59_v10 = vpop.f32.mrf.mxu2  ;;  %v62_v11 = vpop.f32.mrf.mxu3 }
  0x87   :  { %v60_v12 = vadd.f32 %v81_v5, %v59_v10  ;;  %v63_v13 = vadd.f32 %v81_v5, %v62_v11 }
  0x89   :  { %68 = vst.msk [vmem:[%s135_s3 + $0x10] sm:$0xff] %vm65_vm1, %v60_v12 }
  0x8a   :  { %69 = vst.msk [vmem:[%s135_s3 + $0x18] sm:$0xff] %vm65_vm1, %v63_v13 }

// kernel: ultimus_forward.2
= control target key start
LH: loop header
LB: loop body
LE: loop exit
PB: predicated region body
PF: predicated region fallthrough
CT: control target
= control target key end

     0   :  { %vm41_vm0 = vcmask 392192   ;;  %vm83_vm1 = vcmask 64512   ;;  %vm23_vm2 = vcmask 195584   ;;  %v282_v10 = vmov 0.0   ;;  %s388_s1 = inlined_call_operand.vmem [shape: f32[48,24], index: 1, kind: input, shape index: {}]   ;;  %s389_s2 = inlined_call_operand.vmem [shape: f32[1,24], index: 2, kind: input, shape index: {}]   ;;  %s390_s0 = inlined_call_operand.vmem [shape: f32[32,48], index: 0, kind: input, shape index: {}]   ;;  %s391_s4 = inlined_call_operand.vmem [shape: f32[32,8], index: 4, kind: output, shape index: {0}]   ;;  %s392_s3 = inlined_call_operand.vmem [shape: f32[8,48], index: 3, kind: input, shape index: {}]   ;;  %s393_s5 = inlined_call_operand.vmem [shape: f32[8,48], index: 5, kind: output, shape index: {1}]  }
   0x1   :  { %v36_v0 = vld [vmem:[%s388_s1 + $0x28] sm:$0xff]  ;;  %v35_v1 = vld [vmem:[%s388_s1 + $0x20] sm:$0xff]  ;;  %v34_v2 = vld [vmem:[%s388_s1 + $0x18] sm:$0xff]  ;;  %24 = vst.msk [vmem:[#allocation2] sm:$0xff] %vm23_vm2, %v282_v10  ;;  %vm150_vm3 = vcmask 261120   ;;  %vm197_vm4 = vcmask 130112  }
   0x2   :  { %64 = vmatpush.msra.mxu0 %v36_v0  ;;  %269 = vmatpush.msra.mxu3 %v36_v0  ;;  %v33_v3 = vld [vmem:[%s388_s1 + $0x10] sm:$0xff]  ;;  %v32_v4 = vld [vmem:[%s388_s1 + $0x8] sm:$0xff]  ;;  %v31_v5 = vld [vmem:[%s388_s1] sm:$0xff]  ;;  %25 = vst.msk [vmem:[#allocation2 + $0x8] sm:$0xff] %vm23_vm2, %v282_v10 }
   0x3   :  { %v27_v6 = vld [vmem:[%s390_s0] sm:$0xff]  ;;  %26 = vst.msk [vmem:[#allocation2 + $0x10] sm:$0xff] %vm23_vm2, %v282_v10  ;;  %v29_v31 = vld [vmem:[%s390_s0 + $0x10] sm:$0xff]  ;;  %v30_v33 = vld [vmem:[%s390_s0 + $0x18] sm:$0xff] }
   0x4   :  { %65 = vmatpush.msra.mxu0 %v35_v1  ;;  %270 = vmatpush.msra.mxu3 %v35_v1  ;;  %v339_v7 = vld [vmem:[%s389_s2] ss:$0 sm:$0xff]  ;;  %s283_s2 = smov 120   ;;  %v28_v46 = vld [vmem:[%s390_s0 + $0x8] sm:$0xff] }
   0x5   :  { %v226_v32 = vld [vmem:[%s392_s3] sm:$0xff] }
   0x6   :  { %66 = vmatpush.msra.mxu0 %v34_v2  ;;  %271 = vmatpush.msra.mxu3 %v34_v2 }
   0x7   :  { %247 = vmatpush.msra.mxu2 %v226_v32 }
   0x8   :  { %67 = vmatpush.msra.mxu0 %v33_v3  ;;  %272 = vmatpush.msra.mxu3 %v33_v3  ;;  %v115_v14 = vld [vmem:[#allocation2] sm:$0xff] }
   0x9   :  { %v116_v17 = vld [vmem:[#allocation2 + $0x8] sm:$0xff] }
   0xa   :  { %68 = vmatpush.msra.mxu0 %v32_v4  ;;  %273 = vmatpush.msra.mxu3 %v32_v4  ;;  %v117_v20 = vld [vmem:[#allocation2 + $0x10] sm:$0xff] }
   0xc   :  { %69 = vmatpush.msra.mxu0 %v31_v5  ;;  %274 = vmatpush.msra.mxu3 %v31_v5 }
   0xd   :  { %261 = vmatmul.msk.f32.vlgmr.msra.gmra.mxu0 %vm41_vm0, %v27_v6  ;;  %263 = vmatmul.msk.f32.vlgmr.msra.gmra.mxu3 %vm41_vm0, %v29_v31 }
  0x15   :  { %264 = vmatmul.msk.f32.gmra.mxu3 %vm41_vm0, %v30_v33  ;;  %262 = vmatmul.msk.f32.gmra.mxu0 %vm41_vm0, %v28_v46 }
  0x8a   :  { %v71_v8 = vpop.f32.mrf.mxu0 }
  0x8b   :  { %v72_v9 = vadd.f32 %v339_v7, %v71_v8 }
  0x8d   :  { %84 = vst.msk [vmem:[%s391_s4] sm:$0xff] %vm83_vm1, %v72_v9  ;;  %118 = vxpose.xlu0.b32.start.end [1/1] (short) (narrow) %v72_v9, 24  ;;  %175 = vmatpush.msra.mxu1 %v72_v9 }
  0x90   :  { %v77_v48 = vpop.f32.mrf.mxu3 }
  0x91   :  { %v78_v49 = vadd.f32 %v339_v7, %v77_v48 }
  0x92   :  { %v74_v52 = vpop.f32.mrf.mxu0 }
  0x93   :  { %86 = vst.msk [vmem:[%s391_s4 + $0x10] sm:$0xff] %vm83_vm1, %v78_v49  ;;  %v75_v53 = vadd.f32 %v339_v7, %v74_v52 }
  0x95   :  { %85 = vst.msk [vmem:[%s391_s4 + $0x8] sm:$0xff] %vm83_vm1, %v75_v53 }
  0x98   :  { %v80_v50 = vpop.f32.mrf.mxu3 }
  0x99   :  { %v81_v51 = vadd.f32 %v339_v7, %v80_v50 }
  0x9b   :  { %87 = vst.msk [vmem:[%s391_s4 + $0x18] sm:$0xff] %vm83_vm1, %v81_v51 }
 0x131   :  { %v134_v11 = vpop.trf.xlu0 }
 0x132   :  { %265 = vmatmul.msk.f32.vlgmr.msra.gmra.mxu1 %vm150_vm3, %v134_v11 }
 0x139   :  { %v135_v12 = vpop.trf.xlu0 }
 0x13a   :  { %266 = vmatmul.msk.f32.gmra.mxu1 %vm150_vm3, %v135_v12 }
 0x141   :  { %v136_v13 = vpop.trf.xlu0 }
 0x142   :  { %267 = vmatmul.msk.f32.gmra.mxu1 %vm150_vm3, %v136_v13 }
 0x1af   :  { %v177_v15 = vpop.f32.mrf.mxu1 }
 0x1b0   :  { %v186_v16 = vadd.f32 %v177_v15, %v115_v14 }
 0x1b2   :  { %190 = vst.msk [vmem:[#allocation2] sm:$0xff] %vm23_vm2, %v186_v16 }
 0x1b7   :  { %v180_v18 = vpop.f32.mrf.mxu1 }
 0x1b8   :  { %v187_v19 = vadd.f32 %v180_v18, %v116_v17 }
 0x1ba   :  { %191 = vst.msk [vmem:[#allocation2 + $0x8] sm:$0xff] %vm23_vm2, %v187_v19 }
 0x1bf   :  { %v183_v21 = vpop.f32.mrf.mxu1 }
 0x1c0   :  { %v188_v22 = vadd.f32 %v183_v21, %v117_v20 }
 0x1c2   :  { %192 = vst.msk [vmem:[#allocation2 + $0x10] sm:$0xff] %vm23_vm2, %v188_v22 }
 0x1c9   :  { %v196_v23 = vld [vmem:[#allocation2 + $0x10] sm:$0xff] }
 0x1ca   :  { %v198_v24 = vsel %vm197_vm4, %v196_v23, -inf }
 0x1cb   :  { %199 = vmax.xlane.f32.xlu0 %v198_v24 }
 0x23e   :  { %v200_v25 = vpop.xlane.xlu0 %199 }
 0x23f   :  { %v201_v26 = vsub.f32 %v196_v23, %v200_v25 }
 0x241   :  { %v202_v27 = vmul.f32 1.442695, %v201_v26 }
 0x243   :  { %278 = vpow2.f32 %v202_v27 }
 0x249   :  { %v279_v28 = vpop.eup %278 }
 0x24a   :  { %205 = vrot.lane.b32.xlu1 %v279_v28, %s283_s2 }
 0x2bc   :  { %v206_v29 = vpop.permute.xlu1 %205 }
 0x2bd   :  { %v208_v30 = vsel %vm83_vm1, %v206_v29, 0.0 }
 0x2be   :  { %209 = vadd.xlane.f32.xlu1 %v208_v30 }
 0x331   :  { %v210_v34 = vpop.xlane.xlu1 %209 }
 0x332   :  { %280 = vrcp.f32 %v210_v34  ;;  %v222_v38 = vand.u32 2147483648, %v210_v34  ;;  %v220_v40 = vand.u32 2147483647, %v210_v34  ;;  %vm216_vm6 = vweird.f32 %v210_v34 }
 0x334   :  { %v223_v42 = vor.u32 1.1754944e-38, %v222_v38  ;;  %vm221_vm8 = vcmp.eq.f32.partialorder %v220_v40, 8.507059e+37 }
 0x338   :  { %v281_v35 = vpop.eup %280 }
 0x339   :  { %v212_v36 = vmul.f32 %v281_v35, %v210_v34  ;;  %vm217_vm5 = vweird.f32 %v281_v35 }
 0x33a   :  { %vm218_vm7 = vmor %vm216_vm6, %vm217_vm5 }
 0x33b   :  { %v213_v37 = vsub.f32 1.0, %v212_v36 }
 0x33d   :  { %v214_v39 = vmul.f32 %v281_v35, %v213_v37 }
 0x33f   :  { %v215_v41 = vadd.f32 %v281_v35, %v214_v39 }
 0x341   :  { %v219_v43 = vsel %vm218_vm7, %v281_v35, %v215_v41 }
 0x342   :  { %v224_v44 = vsel %vm221_vm8, %v223_v42, %v219_v43 }
 0x343   :  { %v225_v45 = vmul.f32 %v279_v28, %v224_v44 }
 0x345   :  { %228 = vrot.lane.b32.xlu2 %v225_v45, %s283_s2 }
 0x39f   :  { %v229_v47 = vpop.permute.xlu2 %228 }
 0x3a0   :  { %268 = vmatmul.msk.f32.vlgmr.msra.gmra.mxu2 %vm83_vm1, %v229_v47 }
 0x423   :  { %v249_v54 = vpop.f32.mrf.mxu2 }
 0x424   :  { %252 = vst.msk [vmem:[%s393_s5] sm:$0xff] %vm41_vm0, %v249_v54 }

</bundles_post_ra>
